<compile_context>
chip_gen: v5e
topology: v5e:2x2
jax: 0.10.0
libtpu: 0.0.40
codegen_flags: <defaults>
</compile_context>

<pallas_src>
import jax
import jax.numpy as jnp
from jax.experimental import pallas as pl
from jax.experimental.pallas import tpu as pltpu


def _round_up(x, m):
    return ((x + m - 1) // m) * m


# ---------------------------------------------------------------------------
# Kernels
# ---------------------------------------------------------------------------
def _epilogue(feat_f32, text_t_ref, out_ref):
    # Self-consistent cosine: a single bf16 rounding of feat is reused by both
    # the norm and the similarity matmul (both GEMMs stay on the bf16 MXU path).
    feat_b = feat_f32.astype(text_t_ref.dtype)              # [TB, D_pad] bf16
    f32 = feat_b.astype(jnp.float32)
    sq = jnp.sum(f32 * f32, axis=-1, keepdims=True)         # [TB, 1]
    inv_norm = jax.lax.rsqrt(sq + 1e-12)                    # eps guards padded rows
    sim = jnp.dot(feat_b, text_t_ref[...],
                  preferred_element_type=jnp.float32)       # [TB, P_pad]
    out_ref[...] = 1.0 - sim * inv_norm


def _i2cn_kernel_single(img_ref, w_ref, text_t_ref, out_ref):
    """Single K step: the whole contraction fits in one VMEM block."""
    feat = jnp.dot(img_ref[...], w_ref[...], preferred_element_type=jnp.float32)
    _epilogue(feat, text_t_ref, out_ref)


def _i2cn_kernel_ktiled(img_ref, w_ref, text_t_ref, out_ref, acc_ref):
    """K-tiled contraction with a persistent f32 VMEM accumulator."""
    k = pl.program_id(1)
    partial = jnp.dot(img_ref[...], w_ref[...], preferred_element_type=jnp.float32)

    @pl.when(k == 0)
    def _():
        acc_ref[...] = partial            # first step: direct store, no zero-fill

    @pl.when(k > 0)
    def _():
        acc_ref[...] += partial

    @pl.when(k == pl.num_programs(1) - 1)
    def _():
        _epilogue(acc_ref[...], text_t_ref, out_ref)


# ---------------------------------------------------------------------------
# One-time "__init__" parameter prep (constant operands, done once, not per call)
# ---------------------------------------------------------------------------
def prepare_i2cn_params(w_proj, text_features, *, tb_cap=256, tk_max=8192):
    """Pad + bf16-cast W and the (normalized, transposed) text features once.

    Picks TK as the largest multiple of 256 <= tk_max that divides the padded
    F exactly, so the K grid has no dead all-zero tail step.
    """
    F, D = w_proj.shape
    P, D2 = text_features.shape
    assert D == D2

    D_pad = _round_up(D, 128)
    P_pad = _round_up(P, 128)              # lane-dense output (unmasked vst)
    F_pad = _round_up(F, 256)              # bf16 sublane/lane alignment

    tk_max = max(256, (tk_max // 256) * 256)
    if F_pad <= tk_max:
        TK = F_pad                          # single K step, no accumulation loop
    else:
        TK = 256
        for cand in range(tk_max, 255, -256):
            if F_pad % cand == 0:
                TK = cand
                break
        if F_pad % TK != 0:                 # defensive; 256 always divides F_pad
            F_pad = _round_up(F_pad, TK)

    # __init__ glue: normalize text features once (plain JAX, not hot path).
    t_norm = text_features / jnp.linalg.norm(text_features, axis=-1, keepdims=True)

    if (F_pad, D_pad) == (F, D):
        w_pad = w_proj.astype(jnp.bfloat16)
    else:
        w_pad = jnp.zeros((F_pad, D_pad), jnp.bfloat16).at[:F, :D].set(
            w_proj.astype(jnp.bfloat16))

    # Pre-transpose text to [D, P] so both GEMMs contract on the lane dim.
    if (D_pad, P_pad) == (D, P):
        t_pad = t_norm.T.astype(jnp.bfloat16)
    else:
        t_pad = jnp.zeros((D_pad, P_pad), jnp.bfloat16).at[:D, :P].set(
            t_norm.T.astype(jnp.bfloat16))

    return dict(w=w_pad, text_t=t_pad, F=F, D=D, P=P,
                F_pad=F_pad, D_pad=D_pad, P_pad=P_pad, TK=TK, tb_cap=tb_cap)


# ---------------------------------------------------------------------------
# Per-call wrapper (hot path: only the image batch is padded/cast here)
# ---------------------------------------------------------------------------
def i2cn_loss(img_flat, params, *, vmem_cap_bytes=56 * 1024 * 1024):
    """loss[b, p] = 1 - cos_sim(proj(image_b), text_p)."""
    B, F = img_flat.shape
    assert F == params["F"]
    F_pad, D_pad, P_pad, TK = (params["F_pad"], params["D_pad"],
                               params["P_pad"], params["TK"])
    P = params["P"]

    # Balanced, 16-aligned (bf16 sublane) row blocks: avoids a whole padded
    # B block (e.g. B=300 -> 2x160 instead of 2x256 with 212 dead rows).
    tb_cap = params["tb_cap"]
    n_b_blocks = max(1, -(-B // tb_cap))
    TB = _round_up(-(-B // n_b_blocks), 16)
    B_pad = _round_up(B, TB)

    img = img_flat.astype(jnp.bfloat16)
    if (B_pad, F_pad) != (B, F):
        img = jnp.zeros((B_pad, F_pad), jnp.bfloat16).at[:B, :F].set(img)

    n_k = F_pad // TK
    single_step = n_k == 1

    # VMEM budget: double-buffered bf16 inputs + f32 output (+ acc scratch).
    vmem_bytes = (2 * TB * TK * 2 + 2 * TK * D_pad * 2 + 2 * D_pad * P_pad * 2
                  + 2 * TB * P_pad * 4 + (0 if single_step else TB * D_pad * 4))
    vmem_limit = min(max(32 * 1024 * 1024, int(vmem_bytes * 1.5)), vmem_cap_bytes)

    if single_step:
        out = pl.pallas_call(
            _i2cn_kernel_single,
            out_shape=jax.ShapeDtypeStruct((B_pad, P_pad), jnp.float32),
            grid=(B_pad // TB,),
            in_specs=[
                pl.BlockSpec((TB, F_pad), lambda b: (b, 0)),
                pl.BlockSpec((F_pad, D_pad), lambda b: (0, 0)),
                pl.BlockSpec((D_pad, P_pad), lambda b: (0, 0)),
            ],
            out_specs=pl.BlockSpec((TB, P_pad), lambda b: (b, 0)),
            compiler_params=pltpu.CompilerParams(
                dimension_semantics=("parallel",),
                vmem_limit_bytes=vmem_limit,
            ),
        )(img, params["w"], params["text_t"])
    else:
        out = pl.pallas_call(
            _i2cn_kernel_ktiled,
            out_shape=jax.ShapeDtypeStruct((B_pad, P_pad), jnp.float32),
            grid=(B_pad // TB, n_k),
            in_specs=[
                pl.BlockSpec((TB, TK), lambda b, k: (b, k)),
                pl.BlockSpec((TK, D_pad), lambda b, k: (k, 0)),
                pl.BlockSpec((D_pad, P_pad), lambda b, k: (0, 0)),
            ],
            out_specs=pl.BlockSpec((TB, P_pad), lambda b, k: (b, 0)),
            scratch_shapes=[pltpu.VMEM((TB, D_pad), jnp.float32)],
            compiler_params=pltpu.CompilerParams(
                dimension_semantics=("parallel", "arbitrary"),
                vmem_limit_bytes=vmem_limit,
            ),
        )(img, params["w"], params["text_t"])

    return out[:B, :P]


if __name__ == "__main__":
    key = jax.random.PRNGKey(0)
    k_img, k_w, k_txt = jax.random.split(key, 3)

    # Small shapes consistent with the forward pass: a small batch of CHW
    # images (the module unsqueezes a single image; we batch 2 to amortize the
    # W_proj stream), embed dim D=128, P=8 prompts.
    B, C, H, W = 2, 3, 16, 16
    D, P = 128, 8
    F = C * H * W

    images = jax.random.uniform(k_img, (B, C, H, W), dtype=jnp.float32)   # CHW
    img_flat = images.reshape(B, F)

    # Deterministic "__init__" parameters (synthetic stand-ins, not a CLIP ckpt).
    w_proj = jax.random.normal(k_w, (F, D), dtype=jnp.float32) * 0.02
    text_features = jax.random.normal(k_txt, (P, D), dtype=jnp.float32)

    # Pure-JAX reference on the same bf16-rounded operands the kernel feeds the
    # MXU (so only f32 accumulation order differs).
    t_norm = text_features / jnp.linalg.norm(text_features, axis=-1, keepdims=True)
    img_bf = img_flat.astype(jnp.bfloat16).astype(jnp.float32)
    w_bf = w_proj.astype(jnp.bfloat16).astype(jnp.float32)
    t_bf = t_norm.astype(jnp.bfloat16).astype(jnp.float32)
    feat = img_bf @ w_bf
    feat_b = feat.astype(jnp.bfloat16).astype(jnp.float32)
    inv = jax.lax.rsqrt(jnp.sum(feat_b * feat_b, axis=-1, keepdims=True) + 1e-12)
    ref = 1.0 - (feat_b @ t_bf.T) * inv

    # (a) Default config: F=768 fits in one block -> single-step fast path.
    params = prepare_i2cn_params(w_proj, text_features)
    loss = i2cn_loss(img_flat, params)
    jax.block_until_ready(loss)
    assert loss.shape == (B, P)
    assert jnp.allclose(loss, ref, atol=2e-4, rtol=2e-4)

    # (b) tk_max=256 forces the K-tiled accumulation path (3 K steps).
    params_kt = prepare_i2cn_params(w_proj, text_features, tk_max=256)
    loss_kt = i2cn_loss(img_flat, params_kt)
    jax.block_until_ready(loss_kt)
    assert loss_kt.shape == (B, P)
    assert jnp.allclose(loss_kt, ref, atol=2e-4, rtol=2e-4)

    print("KERNEL_OK")
</pallas_src>

<mosaic_0001>
module attributes {stable_mosaic.version = 11 : i64} {
  func.func @_i2cn_kernel_single(%arg0: i32, %arg1: memref<16x768xbf16, #tpu.memory_space<vmem>>, %arg2: memref<768x128xbf16, #tpu.memory_space<vmem>>, %arg3: memref<128x128xbf16, #tpu.memory_space<vmem>>, %arg4: memref<16x128xf32, #tpu.memory_space<vmem>>) attributes {dimension_semantics = [#tpu.dimension_semantics<parallel>], iteration_bounds = array<i64: 1>, scalar_prefetch = 0 : i64, scratch_operands = 0 : i64, tpu.core_type = #tpu.core_type<tc>, window_params = [{transform_indices = @transform_0, window_bounds = array<i64: 16, 768>}, {pipeline_mode = #tpu.pipeline_mode<synchronous>, transform_indices = @transform_1, window_bounds = array<i64: 768, 128>}, {pipeline_mode = #tpu.pipeline_mode<synchronous>, transform_indices = @transform_2, window_bounds = array<i64: 128, 128>}, {transform_indices = @transform_3, window_bounds = array<i64: 16, 128>}]} {
    %c0 = arith.constant 0 : index
    %c0_0 = arith.constant 0 : index
    %0 = vector.load %arg1[%c0, %c0_0] : memref<16x768xbf16, #tpu.memory_space<vmem>>, vector<16x768xbf16>
    %c0_1 = arith.constant 0 : index
    %c0_2 = arith.constant 0 : index
    %1 = vector.load %arg2[%c0_1, %c0_2] : memref<768x128xbf16, #tpu.memory_space<vmem>>, vector<768x128xbf16>
    %cst = arith.constant dense<0.000000e+00> : vector<16x128xf32>
    %2 = tpu.matmul %0, %1, %cst {dimension_numbers = #tpu.dot_dimension_numbers<[1], [0], [0], [1], [0, 0, 1, 1], [], []>} : vector<16x768xbf16>, vector<768x128xbf16>, vector<16x128xf32> -> vector<16x128xf32>
    %3 = arith.truncf %2 : vector<16x128xf32> to vector<16x128xbf16>
    %4 = arith.extf %3 : vector<16x128xbf16> to vector<16x128xf32>
    %5 = arith.mulf %4, %4 : vector<16x128xf32>
    %cst_3 = arith.constant dense<0.000000e+00> : vector<16xf32>
    %6 = vector.multi_reduction <add>, %5, %cst_3 [1] : vector<16x128xf32> to vector<16xf32>
    %7 = vector.shape_cast %6 : vector<16xf32> to vector<16x1xf32>
    %cst_4 = arith.constant 9.99999996E-13 : f32
    %8 = vector.broadcast %cst_4 : f32 to vector<16x1xf32>
    %9 = arith.addf %7, %8 : vector<16x1xf32>
    %10 = math.rsqrt %9 : vector<16x1xf32>
    %c0_5 = arith.constant 0 : index
    %c0_6 = arith.constant 0 : index
    %11 = vector.load %arg3[%c0_5, %c0_6] : memref<128x128xbf16, #tpu.memory_space<vmem>>, vector<128x128xbf16>
    %cst_7 = arith.constant dense<0.000000e+00> : vector<16x128xf32>
    %12 = tpu.matmul %3, %11, %cst_7 {dimension_numbers = #tpu.dot_dimension_numbers<[1], [0], [0], [1], [0, 0, 1, 1], [], []>} : vector<16x128xbf16>, vector<128x128xbf16>, vector<16x128xf32> -> vector<16x128xf32>
    %13 = vector.broadcast %10 : vector<16x1xf32> to vector<16x128xf32>
    %14 = arith.mulf %12, %13 : vector<16x128xf32>
    %cst_8 = arith.constant 1.000000e+00 : f32
    %15 = vector.broadcast %cst_8 : f32 to vector<16x128xf32>
    %16 = arith.subf %15, %14 : vector<16x128xf32>
    %c0_9 = arith.constant 0 : index
    %c0_10 = arith.constant 0 : index
    %17 = vector.load %arg4[%c0_9, %c0_10] : memref<16x128xf32, #tpu.memory_space<vmem>>, vector<16x128xf32>
    tpu.vector_store %arg4[%c0_9, %c0_10], %16 {strides = array<i32>} : memref<16x128xf32, #tpu.memory_space<vmem>>, vector<16x128xf32>,
    return
  }
  func.func @transform_0(%arg0: i32) -> (i32, i32) {
    %c0_i32 = arith.constant 0 : i32
    %c0_i32_0 = arith.constant 0 : i32
    return %arg0, %c0_i32 : i32, i32
  }
  func.func @transform_1(%arg0: i32) -> (i32, i32) {
    %c0_i32 = arith.constant 0 : i32
    %c0_i32_0 = arith.constant 0 : i32
    %c0_i32_1 = arith.constant 0 : i32
    return %c0_i32, %c0_i32_0 : i32, i32
  }
  func.func @transform_2(%arg0: i32) -> (i32, i32) {
    %c0_i32 = arith.constant 0 : i32
    %c0_i32_0 = arith.constant 0 : i32
    %c0_i32_1 = arith.constant 0 : i32
    return %c0_i32, %c0_i32_0 : i32, i32
  }
  func.func @transform_3(%arg0: i32) -> (i32, i32) {
    %c0_i32 = arith.constant 0 : i32
    %c0_i32_0 = arith.constant 0 : i32
    return %arg0, %c0_i32 : i32, i32
  }
}

</mosaic_0001>

<bundles_post_ra>
// kernel: tpu_custom_call.1
= control target key start
LH: loop header
LB: loop body
LE: loop exit
PB: predicated region body
PF: predicated region fallthrough
CT: control target
= control target key end

     0   :  { %8 = vsyncpa [#allocation3], 0  ;;  %s1176_s0 = inlined_call_operand.hbm [shape: bf16[16,768], index: 0, kind: input, shape index: {}]   ;;  %s1177_s1 = inlined_call_operand.hbm [shape: bf16[768,128], index: 1, kind: input, shape index: {}]   ;;  %s1178_s2 = inlined_call_operand.hbm [shape: bf16[128,128], index: 2, kind: input, shape index: {}]   ;;  %s1179_s3 = inlined_call_operand.hbm [shape: f32[16,128], index: 3, kind: output, shape index: {}]  }
   0x1   :  { %9 = vsyncpa [#allocation6], 0  ;;  %s28_s14 = sshll.u32 %s1177_s1, 4  ;;  %s29_s14 = int_to_ptr.hbm [resolvable:$true] %s28_s14 }
   0x2   :  { %10 = vsyncpa [#allocation4], 0  ;;  %s1134_s15 = smov [#allocation5]   ;;  %s15_s19 = sshll.u32 %s1176_s0, 4  ;;  %s16_s19 = int_to_ptr.hbm [resolvable:$true] %s15_s19 }
   0x3   :  { %s30_s16 = sshll.u32 %s1134_s15, 4  ;;  %s1135_s20 = smov 64   ;;  %s31_s16 = int_to_ptr.vmem [resolvable:$true] %s30_s16 }
   0x4   :  { %s1136_s21 = smov 4   ;;  %s1137_s22 = smov [#allocation2]  }
   0x5   :  { %36 = dma.hbm_to_vmem [thread:$0]  %s29_s14, 6144, %s31_s16, [#allocation6], %s1135_s20, %s1135_s20, %s1136_s21  }
   0x6   :  { %s17_s23 = sshll.u32 %s1137_s22, 4  ;;  %s1138_s24 = smov 384   ;;  %s18_s23 = int_to_ptr.vmem [resolvable:$true] %s17_s23 }
   0x7   :  { %s1139_s25 = smov 24   ;;  %s41_s27 = sshll.u32 %s1178_s2, 4  ;;  %s42_s27 = int_to_ptr.hbm [resolvable:$true] %s41_s27 }
   0x8   :  { %23 = dma.hbm_to_vmem [thread:$0]  %s16_s19, 768, %s18_s23, [#allocation3], %s1138_s24, %s1138_s24, %s1139_s25  }
   0x9   :  { %s1140_s28 = smov [#allocation7]  }
   0xa   :  { %s43_s29 = sshll.u32 %s1140_s28, 4  ;;  %s44_s29 = int_to_ptr.vmem [resolvable:$true] %s43_s29 }
   0xb   :  { %49 = dma.hbm_to_vmem [thread:$0]  %s42_s27, 1024, %s44_s29, [#allocation6], %s1135_s20, %s1135_s20, %s1136_s21  }
   0xc   :  { %1128 = dma.done.wait [#allocation3], 768  }
   0xd   :  { %1129 = vsyncadd [#allocation3], 4294966528 }
   0xe   :  { %1130 = dma.done.wait [#allocation6], 7168  }
   0xf   :  { %1131 = vsyncadd [#allocation6], 4294960128  ;;  %v969_v0 = vld [vmem:[#allocation5 + $0x38] sm:$0xff]  ;;  %v968_v4 = vld [vmem:[#allocation5 + $0x30] sm:$0xff]  ;;  %s1141_s0 = smov [#allocation8]   ;;  %s694_s5 = sshll.u32 %s1179_s3, 4  ;;  %s695_s5 = int_to_ptr.hbm [resolvable:$true] %s694_s5 }
  0x10   :  { %v977_v1 = vld [vmem:[#allocation5 + $0x78] sm:$0xff]  ;;  %482 = vmatpush.bf16.msra.mxu0 %v969_v0  ;;  %v976_v5 = vld [vmem:[#allocation5 + $0x70] sm:$0xff]  ;;  %v967_v8 = vld [vmem:[#allocation5 + $0x28] sm:$0xff]  ;;  %s692_s2 = sshll.u32 %s1141_s0, 4  ;;  %s1142_s6 = smov 128   ;;  %s693_s2 = int_to_ptr.vmem [resolvable:$true] %s692_s2 }
  0x11   :  { %v985_v2 = vld [vmem:[#allocation5 + $0xb8] sm:$0xff]  ;;  %496 = vmatpush.bf16.msra.mxu1 %v977_v1  ;;  %v984_v6 = vld [vmem:[#allocation5 + $0xb0] sm:$0xff]  ;;  %v975_v9 = vld [vmem:[#allocation5 + $0x68] sm:$0xff]  ;;  %s1143_s7 = smov 8  }
  0x12   :  { %v993_v3 = vld [vmem:[#allocation5 + $0xf8] sm:$0xff]  ;;  %510 = vmatpush.bf16.msra.mxu2 %v985_v2  ;;  %v992_v7 = vld [vmem:[#allocation5 + $0xf0] sm:$0xff]  ;;  %v983_v10 = vld [vmem:[#allocation5 + $0xa8] sm:$0xff] }
  0x13   :  { %524 = vmatpush.bf16.msra.mxu3 %v993_v3  ;;  %v991_v11 = vld [vmem:[#allocation5 + $0xe8] sm:$0xff]  ;;  %v966_v12 = vld [vmem:[#allocation5 + $0x20] sm:$0xff]  ;;  %v965_v16 = vld [vmem:[#allocation5 + $0x18] sm:$0xff] }
  0x14   :  { %483 = vmatpush.bf16.msra.mxu0 %v968_v4  ;;  %v974_v13 = vld [vmem:[#allocation5 + $0x60] sm:$0xff]  ;;  %v973_v17 = vld [vmem:[#allocation5 + $0x58] sm:$0xff]  ;;  %v964_v20 = vld [vmem:[#allocation5 + $0x10] sm:$0xff] }
  0x15   :  { %497 = vmatpush.bf16.msra.mxu1 %v976_v5  ;;  %v982_v14 = vld [vmem:[#allocation5 + $0xa0] sm:$0xff]  ;;  %v981_v18 = vld [vmem:[#allocation5 + $0x98] sm:$0xff]  ;;  %v972_v21 = vld [vmem:[#allocation5 + $0x50] sm:$0xff] }
  0x16   :  { %511 = vmatpush.bf16.msra.mxu2 %v984_v6  ;;  %v990_v15 = vld [vmem:[#allocation5 + $0xe0] sm:$0xff]  ;;  %v989_v19 = vld [vmem:[#allocation5 + $0xd8] sm:$0xff]  ;;  %v980_v22 = vld [vmem:[#allocation5 + $0x90] sm:$0xff] }
  0x17   :  { %525 = vmatpush.bf16.msra.mxu3 %v992_v7  ;;  %v988_v23 = vld [vmem:[#allocation5 + $0xd0] sm:$0xff]  ;;  %v963_v24 = vld [vmem:[#allocation5 + $0x8] sm:$0xff]  ;;  %v962_v28 = vld [vmem:[#allocation5] sm:$0xff] }
  0x18   :  { %484 = vmatpush.bf16.msra.mxu0 %v967_v8  ;;  %v971_v25 = vld [vmem:[#allocation5 + $0x48] sm:$0xff]  ;;  %v970_v29 = vld [vmem:[#allocation5 + $0x40] sm:$0xff]  ;;  %v1001_v31 = vld [vmem:[#allocation5 + $0x138] sm:$0xff] }
  0x19   :  { %498 = vmatpush.bf16.msra.mxu1 %v975_v9  ;;  %v979_v26 = vld [vmem:[#allocation5 + $0x88] sm:$0xff]  ;;  %v978_v30 = vld [vmem:[#allocation5 + $0x80] sm:$0xff]  ;;  %v710_v32 = vld [vmem:[#allocation2] sm:$0xf] }
  0x1a   :  { %512 = vmatpush.bf16.msra.mxu2 %v983_v10  ;;  %v987_v27 = vld [vmem:[#allocation5 + $0xc8] sm:$0xff]  ;;  %v956_v34 = vld [vmem:[#allocation2 + $0x4] sm:$0xf]  ;;  %v1009_v36 = vld [vmem:[#allocation5 + $0x178] sm:$0xff] }
  0x1b   :  { %526 = vmatpush.bf16.msra.mxu3 %v991_v11  ;;  %v959_v33 = vld [vmem:[#allocation2 + $0x14] sm:$0xf0]  ;;  %v712_v35 = vld [vmem:[#allocation2 + $0x18] sm:$0xf0]  ;;  %v718_v37 = vld [vmem:[#allocation2 + $0x8] sm:$0xf] }
  0x1c   :  { %485 = vmatpush.bf16.msra.mxu0 %v966_v12  ;;  %v960_v38 = vld [vmem:[#allocation2 + $0x1c] sm:$0xf0]  ;;  %v986_v39 = vld [vmem:[#allocation5 + $0xc0] sm:$0xff]  ;;  %v957_v40 = vld [vmem:[#allocation2 + $0xc] sm:$0xf]  ;;  %v711_v42 = vor.u32 %v959_v33, %v710_v32  ;;  %v715_v43 = vor.u32 %v956_v34, %v712_v35 }
  0x1d   :  { %499 = vmatpush.bf16.msra.mxu1 %v974_v13  ;;  %v720_v41 = vld [vmem:[#allocation2 + $0x20] sm:$0xf0]  ;;  %v719_v44 = vor.u32 %v960_v38, %v718_v37  ;;  %v999_v48 = vld [vmem:[#allocation5 + $0x128] sm:$0xff]  ;;  %v998_v50 = vld [vmem:[#allocation5 + $0x120] sm:$0xff] }
  0x1e   :  { %513 = vmatpush.bf16.msra.mxu2 %v982_v14  ;;  %v1000_v45 = vld [vmem:[#allocation5 + $0x130] sm:$0xff]  ;;  %v723_v46 = vor.u32 %v957_v40, %v720_v41  ;;  %v1007_v49 = vld [vmem:[#allocation5 + $0x168] sm:$0xff]  ;;  %v1006_v51 = vld [vmem:[#allocation5 + $0x160] sm:$0xff] }
  0x1f   :  { %527 = vmatpush.bf16.msra.mxu3 %v990_v15  ;;  %v1008_v47 = vld [vmem:[#allocation5 + $0x170] sm:$0xff]  ;;  %v997_v52 = vld [vmem:[#allocation5 + $0x118] sm:$0xff]  ;;  %v995_v56 = vld [vmem:[#allocation5 + $0x108] sm:$0xff] }
  0x20   :  { %486 = vmatpush.bf16.msra.mxu0 %v965_v16  ;;  %v1005_v53 = vld [vmem:[#allocation5 + $0x158] sm:$0xff]  ;;  %v996_v54 = vld [vmem:[#allocation5 + $0x110] sm:$0xff]  ;;  %v1003_v57 = vld [vmem:[#allocation5 + $0x148] sm:$0xff] }
  0x21   :  { %500 = vmatpush.bf16.msra.mxu1 %v973_v17  ;;  %v1004_v55 = vld [vmem:[#allocation5 + $0x150] sm:$0xff]  ;;  %v994_v58 = vld [vmem:[#allocation5 + $0x100] sm:$0xff]  ;;  %v961_v60 = vld [vmem:[#allocation2 + $0x24] sm:$0xf0] }
  0x22   :  { %514 = vmatpush.bf16.msra.mxu2 %v981_v18  ;;  %v726_v59 = vld [vmem:[#allocation2 + $0x10] sm:$0xf]  ;;  %v958_v62 = vld [vmem:[#allocation2 + $0x14] sm:$0xf]  ;;  %v728_v63 = vld [vmem:[#allocation2 + $0x28] sm:$0xf0] }
  0x23   :  { %528 = vmatpush.bf16.msra.mxu3 %v989_v19  ;;  %v1002_v61 = vld [vmem:[#allocation5 + $0x140] sm:$0xff]  ;;  %v727_v0 = vor.u32 %v961_v60, %v726_v59  ;;  %v731_v1 = vor.u32 %v958_v62, %v728_v63  ;;  %v1017_v2 = vld [vmem:[#allocation7 + $0x38] sm:$0xff]  ;;  %v1016_v3 = vld [vmem:[#allocation7 + $0x30] sm:$0xff] }
  0x24   :  { %487 = vmatpush.bf16.msra.mxu0 %v964_v20  ;;  %v1015_v4 = vld [vmem:[#allocation7 + $0x28] sm:$0xff]  ;;  %v1014_v5 = vld [vmem:[#allocation7 + $0x20] sm:$0xff]  ;;  %v1013_v6 = vld [vmem:[#allocation7 + $0x18] sm:$0xff] }
  0x25   :  { %501 = vmatpush.bf16.msra.mxu1 %v972_v21  ;;  %v1012_v7 = vld [vmem:[#allocation7 + $0x10] sm:$0xff]  ;;  %v1011_v8 = vld [vmem:[#allocation7 + $0x8] sm:$0xff]  ;;  %v1010_v11 = vld [vmem:[#allocation7] sm:$0xff] }
  0x26   :  { %515 = vmatpush.bf16.msra.mxu2 %v980_v22 }
  0x27   :  { %529 = vmatpush.bf16.msra.mxu3 %v988_v23 }
  0x28   :  { %488 = vmatpush.bf16.msra.mxu0 %v963_v24 }
  0x29   :  { %502 = vmatpush.bf16.msra.mxu1 %v971_v25 }
  0x2a   :  { %516 = vmatpush.bf16.msra.mxu2 %v979_v26 }
  0x2b   :  { %530 = vmatpush.bf16.msra.mxu3 %v987_v27 }
  0x2c   :  { %489 = vmatpush.bf16.msra.mxu0 %v962_v28 }
  0x2d   :  { %503 = vmatpush.bf16.msra.mxu1 %v970_v29 }
  0x2e   :  { %517 = vmatpush.bf16.msra.mxu2 %v978_v30 }
  0x2f   :  { %531 = vmatpush.bf16.msra.mxu3 %v986_v39  ;;  %490 = vmatmul.bf16.vlgmr.msra.gmra.mxu0 %v711_v42 }
  0x30   :  { %538 = vmatpush.bf16.msrb.mxu0 %v1001_v31  ;;  %504 = vmatmul.bf16.vlgmr.msra.gmra.mxu1 %v715_v43 }
  0x31   :  { %552 = vmatpush.bf16.msrb.mxu1 %v1009_v36  ;;  %518 = vmatmul.bf16.vlgmr.msra.gmra.mxu2 %v719_v44 }
  0x32   :  { %532 = vmatmul.bf16.vlgmr.msra.gmra.mxu3 %v723_v46  ;;  %668 = vmatpush.bf16.msrb.mxu2 %v1017_v2 }
  0x34   :  { %539 = vmatpush.bf16.msrb.mxu0 %v1000_v45 }
  0x35   :  { %553 = vmatpush.bf16.msrb.mxu1 %v1008_v47 }
  0x36   :  { %669 = vmatpush.bf16.msrb.mxu2 %v1016_v3 }
  0x38   :  { %540 = vmatpush.bf16.msrb.mxu0 %v999_v48 }
  0x39   :  { %554 = vmatpush.bf16.msrb.mxu1 %v1007_v49 }
  0x3a   :  { %670 = vmatpush.bf16.msrb.mxu2 %v1015_v4 }
  0x3c   :  { %541 = vmatpush.bf16.msrb.mxu0 %v998_v50 }
  0x3d   :  { %555 = vmatpush.bf16.msrb.mxu1 %v1006_v51 }
  0x3e   :  { %671 = vmatpush.bf16.msrb.mxu2 %v1014_v5 }
  0x40   :  { %542 = vmatpush.bf16.msrb.mxu0 %v997_v52 }
  0x41   :  { %556 = vmatpush.bf16.msrb.mxu1 %v1005_v53 }
  0x42   :  { %672 = vmatpush.bf16.msrb.mxu2 %v1013_v6 }
  0x44   :  { %543 = vmatpush.bf16.msrb.mxu0 %v996_v54 }
  0x45   :  { %557 = vmatpush.bf16.msrb.mxu1 %v1004_v55 }
  0x46   :  { %673 = vmatpush.bf16.msrb.mxu2 %v1012_v7 }
  0x48   :  { %544 = vmatpush.bf16.msrb.mxu0 %v995_v56 }
  0x49   :  { %558 = vmatpush.bf16.msrb.mxu1 %v1003_v57 }
  0x4a   :  { %674 = vmatpush.bf16.msrb.mxu2 %v1011_v8 }
  0x4c   :  { %545 = vmatpush.bf16.msrb.mxu0 %v994_v58 }
  0x4d   :  { %559 = vmatpush.bf16.msrb.mxu1 %v1002_v61 }
  0x4e   :  { %675 = vmatpush.bf16.msrb.mxu2 %v1010_v11 }
  0x4f   :  { %546 = vmatmul.bf16.vlgmr.msrb.gmra.mxu0 %v727_v0 }
  0x50   :  { %560 = vmatmul.bf16.vlgmr.msrb.gmra.mxu1 %v731_v1 }
  0xac   :  { %v491_v9 = vpop.f32.mrf.mxu0 }
  0xad   :  { %v505_v10 = vpop.f32.mrf.mxu1 }
  0xae   :  { %v506_v13 = vadd.f32 %v505_v10, %v491_v9 }
  0xb4   :  { %v519_v12 = vpop.f32.mrf.mxu2  ;;  %v493_v14 = vpop.f32.mrf.mxu0 }
  0xb5   :  { %v507_v15 = vpop.f32.mrf.mxu1  ;;  %v533_v16 = vpop.f32.mrf.mxu3  ;;  %v520_v17 = vadd.f32 %v519_v12, %v506_v13 }
  0xb6   :  { %v508_v19 = vadd.f32 %v507_v15, %v493_v14 }
  0xb7   :  { %v534_v18 = vadd.f32 %v533_v16, %v520_v17 }
  0xbc   :  { %v521_v20 = vpop.f32.mrf.mxu2 }
  0xbd   :  { %v522_v24 = vadd.f32 %v521_v20, %v508_v19  ;;  %v535_v26 = vpop.f32.mrf.mxu3 }
  0xbf   :  { %v536_v28 = vadd.f32 %v535_v26, %v522_v24 }
  0xcc   :  { %v547_v21 = vpop.f32.mrf.mxu0 }
  0xcd   :  { %v548_v22 = vadd.f32 %v547_v21, %v534_v18  ;;  %v561_v23 = vpop.f32.mrf.mxu1 }
  0xcf   :  { %v562_v25 = vadd.f32 %v561_v23, %v548_v22 }
  0xd1   :  { %v566_v27 = vpack.c.bf16 %v562_v25, %v562_v25 }
  0xd3   :  { %v568_v29 = vunpack.c.l.bf16 %v566_v27  ;;  %v616_v36 = vunpack.c.l.b16 %v566_v27 }
  0xd4   :  { %v549_v30 = vpop.f32.mrf.mxu0 }
  0xd5   :  { %v550_v31 = vadd.f32 %v549_v30, %v536_v28  ;;  %v570_v32 = vmul.f32 %v568_v29, %v568_v29  ;;  %v563_v33 = vpop.f32.mrf.mxu1 }
  0xd7   :  { %v564_v34 = vadd.f32 %v563_v33, %v550_v31  ;;  %572 = vadd.xlane.f32.xlu0 %v570_v32 }
  0xd9   :  { %v567_v35 = vpack.c.bf16 %v564_v34, %v564_v34 }
  0xdb   :  { %v617_v37 = vunpack.c.l.b16 %v567_v35  ;;  %v569_v38 = vunpack.c.l.bf16 %v567_v35 }
  0xdd   :  { %v618_v39 = vpack.c.b16 %v617_v37, %v616_v36  ;;  %v571_v40 = vmul.f32 %v569_v38, %v569_v38 }
  0xdf   :  { %676 = vmatmul.bf16.vlgmr.msrb.gmra.mxu2 %v618_v39  ;;  %574 = vadd.xlane.f32.xlu0 %v571_v40 }
 0x14a   :  { %v573_v41 = vpop.xlane.xlu0 %572 }
 0x14b   :  { %v576_v42 = vadd.f32 1e-12, %v573_v41 }
 0x14d   :  { %1028 = vrsqrt.f32 %v576_v42  ;;  %vm584_vm1 = vweird.f32 %v576_v42 }
 0x152   :  { %v575_v43 = vpop.xlane.xlu0 %574 }
 0x153   :  { %v1029_v44 = vpop.eup %1028  ;;  %v577_v45 = vadd.f32 1e-12, %v575_v43 }
 0x154   :  { %v579_v46 = vmul.f32 %v1029_v44, %v576_v42  ;;  %vm585_vm0 = vweird.f32 %v1029_v44 }
 0x155   :  { %1030 = vrsqrt.f32 %v577_v45  ;;  %vm586_vm2 = vmor %vm584_vm1, %vm585_vm0  ;;  %vm594_vm4 = vweird.f32 %v577_v45 }
 0x156   :  { %v580_v47 = vmul.f32 %v1029_v44, %v579_v46 }
 0x158   :  { %v581_v48 = vmul.f32 0.5, %v580_v47 }
 0x15a   :  { %v582_v49 = vsub.f32 1.5, %v581_v48 }
 0x15b   :  { %v1031_v50 = vpop.eup %1030 }
 0x15c   :  { %v589_v51 = vmul.f32 %v1031_v50, %v577_v45  ;;  %v583_v53 = vmul.f32 %v1029_v44, %v582_v49  ;;  %vm595_vm3 = vweird.f32 %v1031_v50 }
 0x15d   :  { %vm596_vm5 = vmor %vm594_vm4, %vm595_vm3 }
 0x15e   :  { %v590_v52 = vmul.f32 %v1031_v50, %v589_v51  ;;  %v587_v56 = vsel %vm586_vm2, %v1029_v44, %v583_v53 }
 0x160   :  { %v591_v54 = vmul.f32 0.5, %v590_v52 }
 0x162   :  { %v592_v55 = vsub.f32 1.5, %v591_v54  ;;  %v677_v57 = vpop.f32.mrf.mxu2 }
 0x163   :  { %v682_v58 = vmul.f32 %v677_v57, %v587_v56 }
 0x164   :  { %v593_v60 = vmul.f32 %v1031_v50, %v592_v55 }
 0x165   :  { %v684_v59 = vsub.f32 1.0, %v682_v58 }
 0x166   :  { %v597_v61 = vsel %vm596_vm5, %v1031_v50, %v593_v60 }
 0x167   :  { %686 = vst [vmem:[#allocation8] sm:$0xff] %v684_v59 }
 0x16a   :  { %v679_v62 = vpop.f32.mrf.mxu2 }
 0x16b   :  { %v683_v63 = vmul.f32 %v679_v62, %v597_v61 }
 0x16d   :  { %v685_v0 = vsub.f32 1.0, %v683_v63 }
 0x16f   :  { %687 = vst [vmem:[#allocation8 + $0x8] sm:$0xff] %v685_v0 }
 0x170   :  { %700 = dma.vmem_to_hbm [thread:$0]  %s693_s2, 256, %s695_s5, [#allocation4], %s1142_s6, %s1142_s6, %s1143_s7  }
 0x171   :  { %1132 = dma.done.wait [#allocation4], 256  }
 0x172   :  { %1133 = vsyncadd [#allocation4], 4294967040 }
 0x173   :  { %705 = vsyncpa [#allocation3], 1 }
 0x174   :  { %706 = vsyncpa [#allocation6], 1 }
 0x175   :  { %707 = vsyncpa [#allocation4], 1 }

</bundles_post_ra>
